<compile_context>
chip_gen: v7x
topology: tpu7x:2x2x1
jax: 0.10.0
libtpu: 0.0.40
codegen_flags: <defaults>
</compile_context>

<pallas_src>
import jax
import jax.numpy as jnp
from jax.experimental import pallas as pl
from jax.experimental.pallas import tpu as pltpu

LANE = 128
TARGET_BLOCK_BYTES = 2 * 1024 * 1024   # ~2 MiB of HBM per input per grid step
NUM_CORES = 2                          # v7x has 2 TCs; extra axis is harmless on v5e/v6e


def _round_up(a, b):
    return -(-a // b) * b


def _make_kernel(steps_per_core, block_rows):
    blk_elems = block_rows * LANE

    def kernel(cnt_ref, x_ref, t_ref, out_ref):
        c = pl.program_id(0)
        i = pl.program_id(1)

        # Output block (1, 24, 128) stays VMEM-resident across the inner
        # (arbitrary) axis: init once per core sweep, accumulate every step.
        @pl.when(i == 0)
        def _():
            out_ref[...] = jnp.zeros_like(out_ref)

        x = x_ref[...].astype(jnp.float32)
        t = t_ref[...].astype(jnp.float32)

        # Numerically stable softplus(-x) = max(-x,0) + log(1 + exp(-|x|)).
        sp = jnp.maximum(-x, 0.0) + jnp.log(1.0 + jnp.exp(-jnp.abs(x)))
        base = x - x * t + sp
        wterm = t * sp

        b = c * steps_per_core + i          # global block index
        n_valid = cnt_ref[b]                # valid elements in this block (SMEM)

        def reduce_block(v):
            # Layout-preserving split of the sublane dim; sum over the major
            # axis is pure vreg VALU adds (no XLU cross-lane work per step).
            return jnp.sum(v.reshape(block_rows // 8, 8, LANE), axis=0)

        def accumulate(tv, bv, wv):
            out_ref[0, 0:8, :] += reduce_block(tv)     # S_t partial
            out_ref[0, 8:16, :] += reduce_block(bv)    # S_base partial
            out_ref[0, 16:24, :] += reduce_block(wv)   # S_w partial

        full = n_valid == blk_elems

        # Steady state: no mask arithmetic at all.
        @pl.when(full)
        def _():
            accumulate(t, base, wterm)

        # Partial / empty block (at most one per kernel, plus clamped
        # duplicate blocks on the last core which have n_valid == 0).
        @pl.when(jnp.logical_not(full))
        def _():
            row = jax.lax.broadcasted_iota(jnp.int32, (block_rows, LANE), 0)
            col = jax.lax.broadcasted_iota(jnp.int32, (block_rows, LANE), 1)
            valid = row * LANE + col < n_valid
            accumulate(jnp.where(valid, t, 0.0),
                       jnp.where(valid, base, 0.0),
                       jnp.where(valid, wterm, 0.0))

    return kernel


def loss_classi(output, label):
    """Equivalent of Loss_classi.forward(output, label) -> scalar loss (f32)."""
    assert output.shape == label.shape, "Target size must match input size"
    total = int(output.size)
    assert total > 0

    x_flat = output.reshape(-1)
    t_flat = label.reshape(-1)

    itemsizes = (jnp.dtype(output.dtype).itemsize, jnp.dtype(label.dtype).itemsize)
    # Sublane packing requirement: 8 for f32, 16 for bf16, 32 for int8/fp8.
    mult = max(32 // min(itemsizes), 8)
    max_block_rows = max(
        _round_up(TARGET_BLOCK_BYTES // (LANE * max(itemsizes)), mult), mult)

    rows = -(-total // LANE)                 # ceil(total / 128)
    rows_p = _round_up(rows, mult)           # pad only to sublane packing
    pad = rows_p * LANE - total
    if pad:                                  # <= (mult*128 - 1) elements
        x_flat = jnp.pad(x_flat, (0, pad))
        t_flat = jnp.pad(t_flat, (0, pad))
    x2d = x_flat.reshape(rows_p, LANE)
    t2d = t_flat.reshape(rows_p, LANE)

    block_rows = min(max_block_rows, rows_p)
    grid_rows = -(-rows_p // block_rows)
    steps_per_core = -(-grid_rows // NUM_CORES)
    num_blocks = NUM_CORES * steps_per_core
    blk_elems = block_rows * LANE

    # Per-block valid-element counts (Python ints -> no int32 overflow; each
    # entry is bounded by blk_elems).  Blocks past the data get count 0.
    cnt = jnp.array(
        [min(max(total - b * blk_elems, 0), blk_elems) for b in range(num_blocks)],
        dtype=jnp.int32)

    last_blk = grid_rows - 1

    def in_map(c, i, cnt_ref):
        # Clamp so the (at most NUM_CORES-1) overhanging steps re-fetch the
        # last valid block instead of issuing an OOB DMA; their count is 0.
        return (jnp.minimum(c * steps_per_core + i, last_blk), 0)

    kernel = _make_kernel(steps_per_core, block_rows)

    bytes_accessed = (total * (itemsizes[0] + itemsizes[1])
                      + NUM_CORES * 24 * LANE * 4)

    partials = pl.pallas_call(
        kernel,
        out_shape=jax.ShapeDtypeStruct((NUM_CORES, 24, LANE), jnp.float32),
        grid_spec=pltpu.PrefetchScalarGridSpec(
            num_scalar_prefetch=1,               # per-block valid counts in SMEM
            grid=(NUM_CORES, steps_per_core),
            in_specs=[
                pl.BlockSpec((block_rows, LANE), in_map),
                pl.BlockSpec((block_rows, LANE), in_map),
            ],
            out_specs=pl.BlockSpec((1, 24, LANE), lambda c, i, cnt_ref: (c, 0, 0)),
        ),
        compiler_params=pltpu.CompilerParams(
            dimension_semantics=("parallel", "arbitrary"),
            vmem_limit_bytes=32 * 1024 * 1024),
        cost_estimate=pl.CostEstimate(
            flops=14 * total,
            transcendentals=2 * total,
            bytes_accessed=int(bytes_accessed)),
    )(cnt, x2d, t2d)

    sums = jnp.sum(partials.reshape(NUM_CORES, 3, 8, LANE), axis=(0, 2, 3))
    pos, base_sum, w_sum = sums[0], sums[1], sums[2]

    total_f = jnp.float32(total)
    pos_num = jnp.maximum(pos - 1.0, 0.0) + 1.0
    neg_num = jnp.maximum(total_f - pos - 1.0, 0.0) + 1.0
    pos_w = neg_num / pos_num

    ce_sum = base_sum + (pos_w - 1.0) * w_sum
    return ce_sum / total_f                      # reduction == 'elementwise_mean'


def _reference_loss(output, label):
    """Pure-JAX reference mirroring the PyTorch code exactly."""
    x = output.astype(jnp.float32)
    t = label.astype(jnp.float32)
    total = x.size
    pos = jnp.sum(t)
    pos_num = jax.nn.relu(pos - 1.0) + 1.0
    neg_num = jax.nn.relu(total - pos - 1.0) + 1.0
    pos_w = neg_num / pos_num
    max_val = jnp.maximum(-x, 0.0)
    log_weight = 1.0 + (pos_w - 1.0) * t
    ce = x - x * t + log_weight * (
        max_val + jnp.log(jnp.exp(-max_val) + jnp.exp(-x - max_val)))
    return jnp.mean(ce)


if __name__ == "__main__":
    key = jax.random.PRNGKey(0)
    k1, k2, k3, k4 = jax.random.split(key, 4)

    # (N, C, H, W) classification-head logits — lane-aligned size.
    shape = (2, 4, 16, 16)                        # 2048 elements
    output = jax.random.normal(k1, shape, dtype=jnp.float32)
    label = (jax.random.uniform(k2, shape) > 0.7).astype(jnp.float32)

    loss = jax.block_until_ready(loss_classi(output, label))
    ref = jax.block_until_ready(_reference_loss(output, label))
    assert jnp.allclose(loss, ref, rtol=1e-5, atol=1e-5), (loss, ref)

    # Ragged shape exercising the partial-block masked path.
    shape2 = (2, 3, 7, 5)                         # 210 elements
    output2 = jax.random.normal(k3, shape2, dtype=jnp.float32)
    label2 = (jax.random.uniform(k4, shape2) > 0.5).astype(jnp.float32)

    loss2 = jax.block_until_ready(loss_classi(output2, label2))
    ref2 = jax.block_until_ready(_reference_loss(output2, label2))
    assert jnp.allclose(loss2, ref2, rtol=1e-5, atol=1e-5), (loss2, ref2)

    print("KERNEL_OK")
</pallas_src>

<mosaic_0001>
module attributes {stable_mosaic.version = 11 : i64} {
  func.func @kernel(%arg0: i32, %arg1: i32, %arg2: memref<2xi32, #tpu.memory_space<smem>>, %arg3: memref<16x128xf32, #tpu.memory_space<vmem>>, %arg4: memref<16x128xf32, #tpu.memory_space<vmem>>, %arg5: memref<1x24x128xf32, #tpu.memory_space<vmem>>) attributes {dimension_semantics = [#tpu.dimension_semantics<parallel>, #tpu.dimension_semantics<arbitrary>], iteration_bounds = array<i64: 2, 1>, scalar_prefetch = 1 : i64, scratch_operands = 0 : i64, tpu.core_type = #tpu.core_type<tc>, window_params = [{transform_indices = @transform_0, window_bounds = array<i64: 16, 128>}, {transform_indices = @transform_1, window_bounds = array<i64: 16, 128>}, {transform_indices = @transform_2, window_bounds = array<i64: 1, 24, 128>}]} {
    %c0_i32 = arith.constant 0 : i32
    %0 = arith.cmpi eq, %arg1, %c0_i32 : i32
    %1 = arith.extui %0 : i1 to i32
    %c0_i32_0 = arith.constant 0 : i32
    %2 = arith.cmpi ne, %1, %c0_i32_0 : i32
    scf.if %2 {
      %cst_9 = arith.constant 0.000000e+00 : f32
      %31 = vector.broadcast %cst_9 : f32 to vector<1x24x128xf32>
      %c0_10 = arith.constant 0 : index
      %c0_11 = arith.constant 0 : index
      %c0_12 = arith.constant 0 : index
      %32 = vector.load %arg5[%c0_10, %c0_11, %c0_12] : memref<1x24x128xf32, #tpu.memory_space<vmem>>, vector<1x24x128xf32>
      tpu.vector_store %arg5[%c0_10, %c0_11, %c0_12], %31 {strides = array<i32>} : memref<1x24x128xf32, #tpu.memory_space<vmem>>, vector<1x24x128xf32>,
    } else {
    }
    %c0 = arith.constant 0 : index
    %c0_1 = arith.constant 0 : index
    %3 = vector.load %arg3[%c0, %c0_1] : memref<16x128xf32, #tpu.memory_space<vmem>>, vector<16x128xf32>
    %c0_2 = arith.constant 0 : index
    %c0_3 = arith.constant 0 : index
    %4 = vector.load %arg4[%c0_2, %c0_3] : memref<16x128xf32, #tpu.memory_space<vmem>>, vector<16x128xf32>
    %cst = arith.constant 0.000000e+00 : f32
    %5 = vector.broadcast %cst : f32 to vector<16x128xf32>
    %6 = arith.subf %5, %3 : vector<16x128xf32>
    %cst_4 = arith.constant 0.000000e+00 : f32
    %7 = vector.broadcast %cst_4 : f32 to vector<16x128xf32>
    %8 = arith.maximumf %6, %7 : vector<16x128xf32>
    %9 = math.absf %3 : vector<16x128xf32>
    %cst_5 = arith.constant 0.000000e+00 : f32
    %10 = vector.broadcast %cst_5 : f32 to vector<16x128xf32>
    %11 = arith.subf %10, %9 : vector<16x128xf32>
    %12 = math.exp %11 : vector<16x128xf32>
    %cst_6 = arith.constant 1.000000e+00 : f32
    %13 = vector.broadcast %cst_6 : f32 to vector<16x128xf32>
    %14 = arith.addf %13, %12 : vector<16x128xf32>
    %15 = math.log %14 : vector<16x128xf32>
    %16 = arith.addf %8, %15 : vector<16x128xf32>
    %17 = arith.mulf %3, %4 : vector<16x128xf32>
    %18 = arith.subf %3, %17 : vector<16x128xf32>
    %19 = arith.addf %18, %16 : vector<16x128xf32>
    %20 = arith.mulf %4, %16 : vector<16x128xf32>
    %c1_i32 = arith.constant 1 : i32
    %21 = arith.muli %arg0, %c1_i32 : i32
    %22 = arith.addi %21, %arg1 : i32
    %23 = arith.index_cast %22 : i32 to index
    %24 = memref.load %arg2[%23] : memref<2xi32, #tpu.memory_space<smem>>
    %c2048_i32 = arith.constant 2048 : i32
    %25 = arith.cmpi eq, %24, %c2048_i32 : i32
    %26 = arith.extui %25 : i1 to i32
    %c0_i32_7 = arith.constant 0 : i32
    %27 = arith.cmpi ne, %26, %c0_i32_7 : i32
    scf.if %27 {
      %c0_9 = arith.constant 0 : index
      %c0_10 = arith.constant 0 : index
      %c0_11 = arith.constant 0 : index
      %31 = vector.load %arg5[%c0_9, %c0_10, %c0_11] : memref<1x24x128xf32, #tpu.memory_space<vmem>>, vector<1x8x128xf32>
      %32 = vector.shape_cast %31 : vector<1x8x128xf32> to vector<8x128xf32>
      %33 = vector.shape_cast %4 : vector<16x128xf32> to vector<2x8x128xf32>
      %cst_12 = arith.constant dense<0.000000e+00> : vector<8x128xf32>
      %34 = vector.multi_reduction <add>, %33, %cst_12 [0] : vector<2x8x128xf32> to vector<8x128xf32>
      %35 = arith.addf %32, %34 : vector<8x128xf32>
      %c0_13 = arith.constant 0 : index
      %c0_14 = arith.constant 0 : index
      %c0_15 = arith.constant 0 : index
      %36 = vector.load %arg5[%c0_13, %c0_14, %c0_15] : memref<1x24x128xf32, #tpu.memory_space<vmem>>, vector<1x8x128xf32>
      %37 = vector.shape_cast %36 : vector<1x8x128xf32> to vector<8x128xf32>
      %38 = vector.shape_cast %35 : vector<8x128xf32> to vector<1x8x128xf32>
      tpu.vector_store %arg5[%c0_13, %c0_14, %c0_15], %38 {strides = array<i32>} : memref<1x24x128xf32, #tpu.memory_space<vmem>>, vector<1x8x128xf32>,
      %c0_16 = arith.constant 0 : index
      %c8 = arith.constant 8 : index
      %c0_17 = arith.constant 0 : index
      %39 = vector.load %arg5[%c0_16, %c8, %c0_17] : memref<1x24x128xf32, #tpu.memory_space<vmem>>, vector<1x8x128xf32>
      %40 = vector.shape_cast %39 : vector<1x8x128xf32> to vector<8x128xf32>
      %41 = vector.shape_cast %19 : vector<16x128xf32> to vector<2x8x128xf32>
      %cst_18 = arith.constant dense<0.000000e+00> : vector<8x128xf32>
      %42 = vector.multi_reduction <add>, %41, %cst_18 [0] : vector<2x8x128xf32> to vector<8x128xf32>
      %43 = arith.addf %40, %42 : vector<8x128xf32>
      %c0_19 = arith.constant 0 : index
      %c8_20 = arith.constant 8 : index
      %c0_21 = arith.constant 0 : index
      %44 = vector.load %arg5[%c0_19, %c8_20, %c0_21] : memref<1x24x128xf32, #tpu.memory_space<vmem>>, vector<1x8x128xf32>
      %45 = vector.shape_cast %44 : vector<1x8x128xf32> to vector<8x128xf32>
      %46 = vector.shape_cast %43 : vector<8x128xf32> to vector<1x8x128xf32>
      tpu.vector_store %arg5[%c0_19, %c8_20, %c0_21], %46 {strides = array<i32>} : memref<1x24x128xf32, #tpu.memory_space<vmem>>, vector<1x8x128xf32>,
      %c0_22 = arith.constant 0 : index
      %c16 = arith.constant 16 : index
      %c0_23 = arith.constant 0 : index
      %47 = vector.load %arg5[%c0_22, %c16, %c0_23] : memref<1x24x128xf32, #tpu.memory_space<vmem>>, vector<1x8x128xf32>
      %48 = vector.shape_cast %47 : vector<1x8x128xf32> to vector<8x128xf32>
      %49 = vector.shape_cast %20 : vector<16x128xf32> to vector<2x8x128xf32>
      %cst_24 = arith.constant dense<0.000000e+00> : vector<8x128xf32>
      %50 = vector.multi_reduction <add>, %49, %cst_24 [0] : vector<2x8x128xf32> to vector<8x128xf32>
      %51 = arith.addf %48, %50 : vector<8x128xf32>
      %c0_25 = arith.constant 0 : index
      %c16_26 = arith.constant 16 : index
      %c0_27 = arith.constant 0 : index
      %52 = vector.load %arg5[%c0_25, %c16_26, %c0_27] : memref<1x24x128xf32, #tpu.memory_space<vmem>>, vector<1x8x128xf32>
      %53 = vector.shape_cast %52 : vector<1x8x128xf32> to vector<8x128xf32>
      %54 = vector.shape_cast %51 : vector<8x128xf32> to vector<1x8x128xf32>
      tpu.vector_store %arg5[%c0_25, %c16_26, %c0_27], %54 {strides = array<i32>} : memref<1x24x128xf32, #tpu.memory_space<vmem>>, vector<1x8x128xf32>,
    } else {
    }
    %true = arith.constant true
    %28 = arith.xori %25, %true : i1
    %29 = arith.extui %28 : i1 to i32
    %c0_i32_8 = arith.constant 0 : i32
    %30 = arith.cmpi ne, %29, %c0_i32_8 : i32
    scf.if %30 {
      %31 = tpu.iota {dimensions = array<i32: 0>} : vector<16x128xi32>
      %32 = tpu.iota {dimensions = array<i32: 1>} : vector<16x128xi32>
      %c128_i32 = arith.constant 128 : i32
      %33 = vector.broadcast %c128_i32 : i32 to vector<16x128xi32>
      %34 = arith.muli %31, %33 : vector<16x128xi32>
      %35 = arith.addi %34, %32 : vector<16x128xi32>
      %36 = vector.broadcast %24 : i32 to vector<16x128xi32>
      %37 = arith.cmpi slt, %35, %36 : vector<16x128xi32>
      %cst_9 = arith.constant 0.000000e+00 : f32
      %38 = vector.broadcast %cst_9 : f32 to vector<16x128xf32>
      %39 = arith.select %37, %4, %38 : vector<16x128xi1>, vector<16x128xf32>
      %cst_10 = arith.constant 0.000000e+00 : f32
      %40 = vector.broadcast %cst_10 : f32 to vector<16x128xf32>
      %41 = arith.select %37, %19, %40 : vector<16x128xi1>, vector<16x128xf32>
      %cst_11 = arith.constant 0.000000e+00 : f32
      %42 = vector.broadcast %cst_11 : f32 to vector<16x128xf32>
      %43 = arith.select %37, %20, %42 : vector<16x128xi1>, vector<16x128xf32>
      %c0_12 = arith.constant 0 : index
      %c0_13 = arith.constant 0 : index
      %c0_14 = arith.constant 0 : index
      %44 = vector.load %arg5[%c0_12, %c0_13, %c0_14] : memref<1x24x128xf32, #tpu.memory_space<vmem>>, vector<1x8x128xf32>
      %45 = vector.shape_cast %44 : vector<1x8x128xf32> to vector<8x128xf32>
      %46 = vector.shape_cast %39 : vector<16x128xf32> to vector<2x8x128xf32>
      %cst_15 = arith.constant dense<0.000000e+00> : vector<8x128xf32>
      %47 = vector.multi_reduction <add>, %46, %cst_15 [0] : vector<2x8x128xf32> to vector<8x128xf32>
      %48 = arith.addf %45, %47 : vector<8x128xf32>
      %c0_16 = arith.constant 0 : index
      %c0_17 = arith.constant 0 : index
      %c0_18 = arith.constant 0 : index
      %49 = vector.load %arg5[%c0_16, %c0_17, %c0_18] : memref<1x24x128xf32, #tpu.memory_space<vmem>>, vector<1x8x128xf32>
      %50 = vector.shape_cast %49 : vector<1x8x128xf32> to vector<8x128xf32>
      %51 = vector.shape_cast %48 : vector<8x128xf32> to vector<1x8x128xf32>
      tpu.vector_store %arg5[%c0_16, %c0_17, %c0_18], %51 {strides = array<i32>} : memref<1x24x128xf32, #tpu.memory_space<vmem>>, vector<1x8x128xf32>,
      %c0_19 = arith.constant 0 : index
      %c8 = arith.constant 8 : index
      %c0_20 = arith.constant 0 : index
      %52 = vector.load %arg5[%c0_19, %c8, %c0_20] : memref<1x24x128xf32, #tpu.memory_space<vmem>>, vector<1x8x128xf32>
      %53 = vector.shape_cast %52 : vector<1x8x128xf32> to vector<8x128xf32>
      %54 = vector.shape_cast %41 : vector<16x128xf32> to vector<2x8x128xf32>
      %cst_21 = arith.constant dense<0.000000e+00> : vector<8x128xf32>
      %55 = vector.multi_reduction <add>, %54, %cst_21 [0] : vector<2x8x128xf32> to vector<8x128xf32>
      %56 = arith.addf %53, %55 : vector<8x128xf32>
      %c0_22 = arith.constant 0 : index
      %c8_23 = arith.constant 8 : index
      %c0_24 = arith.constant 0 : index
      %57 = vector.load %arg5[%c0_22, %c8_23, %c0_24] : memref<1x24x128xf32, #tpu.memory_space<vmem>>, vector<1x8x128xf32>
      %58 = vector.shape_cast %57 : vector<1x8x128xf32> to vector<8x128xf32>
      %59 = vector.shape_cast %56 : vector<8x128xf32> to vector<1x8x128xf32>
      tpu.vector_store %arg5[%c0_22, %c8_23, %c0_24], %59 {strides = array<i32>} : memref<1x24x128xf32, #tpu.memory_space<vmem>>, vector<1x8x128xf32>,
      %c0_25 = arith.constant 0 : index
      %c16 = arith.constant 16 : index
      %c0_26 = arith.constant 0 : index
      %60 = vector.load %arg5[%c0_25, %c16, %c0_26] : memref<1x24x128xf32, #tpu.memory_space<vmem>>, vector<1x8x128xf32>
      %61 = vector.shape_cast %60 : vector<1x8x128xf32> to vector<8x128xf32>
      %62 = vector.shape_cast %43 : vector<16x128xf32> to vector<2x8x128xf32>
      %cst_27 = arith.constant dense<0.000000e+00> : vector<8x128xf32>
      %63 = vector.multi_reduction <add>, %62, %cst_27 [0] : vector<2x8x128xf32> to vector<8x128xf32>
      %64 = arith.addf %61, %63 : vector<8x128xf32>
      %c0_28 = arith.constant 0 : index
      %c16_29 = arith.constant 16 : index
      %c0_30 = arith.constant 0 : index
      %65 = vector.load %arg5[%c0_28, %c16_29, %c0_30] : memref<1x24x128xf32, #tpu.memory_space<vmem>>, vector<1x8x128xf32>
      %66 = vector.shape_cast %65 : vector<1x8x128xf32> to vector<8x128xf32>
      %67 = vector.shape_cast %64 : vector<8x128xf32> to vector<1x8x128xf32>
      tpu.vector_store %arg5[%c0_28, %c16_29, %c0_30], %67 {strides = array<i32>} : memref<1x24x128xf32, #tpu.memory_space<vmem>>, vector<1x8x128xf32>,
    } else {
    }
    return
  }
  func.func @transform_0(%arg0: i32, %arg1: i32, %arg2: memref<2xi32, #tpu.memory_space<smem>>) -> (i32, i32) {
    %c1_i32 = arith.constant 1 : i32
    %0 = arith.muli %arg0, %c1_i32 : i32
    %1 = arith.addi %0, %arg1 : i32
    %c0_i32 = arith.constant 0 : i32
    %2 = arith.minsi %1, %c0_i32 : i32
    %c0_i32_0 = arith.constant 0 : i32
    %c0_i32_1 = arith.constant 0 : i32
    return %2, %c0_i32_0 : i32, i32
  }
  func.func @transform_1(%arg0: i32, %arg1: i32, %arg2: memref<2xi32, #tpu.memory_space<smem>>) -> (i32, i32) {
    %c1_i32 = arith.constant 1 : i32
    %0 = arith.muli %arg0, %c1_i32 : i32
    %1 = arith.addi %0, %arg1 : i32
    %c0_i32 = arith.constant 0 : i32
    %2 = arith.minsi %1, %c0_i32 : i32
    %c0_i32_0 = arith.constant 0 : i32
    %c0_i32_1 = arith.constant 0 : i32
    return %2, %c0_i32_0 : i32, i32
  }
  func.func @transform_2(%arg0: i32, %arg1: i32, %arg2: memref<2xi32, #tpu.memory_space<smem>>) -> (i32, i32, i32) {
    %c0_i32 = arith.constant 0 : i32
    %c0_i32_0 = arith.constant 0 : i32
    %c0_i32_1 = arith.constant 0 : i32
    return %arg0, %c0_i32, %c0_i32_0 : i32, i32, i32
  }
}

</mosaic_0001>

<bundles_post_ra>
// kernel: tpu_custom_call.1
= control target key start
LH: loop header
LB: loop body
LE: loop exit
PB: predicated region body
PF: predicated region fallthrough
CT: control target
= control target key end

     0   :  { %s1037_s0 = inlined_call_operand.hbm [shape: s32[2], index: 0, kind: input, shape index: {}]   ;;  %s1038_s1 = inlined_call_operand.hbm [shape: f32[16,128], index: 1, kind: input, shape index: {}]   ;;  %s1039_s2 = inlined_call_operand.hbm [shape: f32[16,128], index: 2, kind: input, shape index: {}]   ;;  %s1040_s3 = inlined_call_operand.hbm [shape: f32[2,24,128], index: 3, kind: output, shape index: {}]  }
   0x1   :  { %s581_s14 = scalar_lea.hbm %s1037_s0, 16 }
   0x2   :  { %p582_p0 = scmp.ne.s32.totalorder %s1037_s0, %s581_s14  ;;  %p585_p1 = scmp.lt.u32.totalorder %s581_s14, %s1037_s0 }
   0x4   :  { %p587_p2 = pnand %p585_p1, %p582_p0 }
   0x6   :  { %590 = shalt.err (!%p587_p2)  }
   0x7   :  { %s762_s19 = smov [#allocation3]  }
   0x8   :  { %9 = dma.hbm_to_smem %s1037_s0, 16, %s762_s19, [#allocation2] }
   0x9   :  { %715 = dma.done.wait [#allocation2], 16 }
   0xa   :  { %716 = vsyncadd [#allocation2], 4294967280 }
   0xb   :  { %11 = sfence }
   0xc   :  { %12 = vsyncpa [#allocation5], 0 }
   0xd   :  { %14 = vsyncpa [#allocation5 + $0x1], 0 }
   0xe   :  { %15 = vsyncpa [#allocation8], 0 }
   0xf   :  { %17 = vsyncpa [#allocation8 + $0x1], 0 }
  0x10   :  { %18 = vsyncpa [#allocation6], 0 }
  0x11   :  { %20 = vsyncpa [#allocation6 + $0x1], 0  ;;  %s803_s22 = smov 0   ;;  %s805_s23 = smov 0  }
  0x12   :  { %s807_s24 = smov 0   ;;  %s809_s25 = smov 0  }
  0x13   :  { %s811_s26 = smov 0   ;;  %s813_s0 = smov 0  }
  0x14   :  { %s815_s27 = smov 0   ;;  %s817_s28 = smov 0  }
  0x15 LB: > { %s454_s29 = sadd.s32 4294967295, %s760_s28   ;;  %s455_s30 = sadd.s32 4294967294, %s760_s28   ;;  %s760_s28 = sphi %s817_s28, %s26_s28   ;;  %s756_s27 = sphi %s815_s27, %s1059_s27   ;;  %s752_s0 = sphi %s813_s0, %s1058_s0   ;;  %s748_s26 = sphi %s811_s26, %s1027_s26   ;;  %s744_s25 = sphi %s809_s25, %s1057_s25   ;;  %s740_s24 = sphi %s807_s24, %s1056_s24   ;;  %s736_s23 = sphi %s805_s23, %s1055_s23   ;;  %s732_s22 = sphi %s803_s22, %s1054_s22  }
  0x16   : > { %s38_s4 = sadd.s32 1, %s756_s27  ;;  %p729_p4 = scmp.ne.s32.totalorder %s748_s26, 0 }
  0x17   : > { %p40_p3 = scmp.ge.s32.totalorder %s38_s4, 2  ;;  %p59_p5 = scmp.eq.s32.totalorder %s760_s28, 0 }
  0x18   : > { %p64_p6 = scmp.ne.s32.totalorder %s748_s26, %s744_s25  ;;  %p65_p8 = scmp.eq.s32.totalorder %s454_s29, 0 }
  0x19   : > { %s1061_s4 = smov (%p40_p3, %s38_s4), 0  ;;  %p849_p7 = por %p729_p4, %p59_p5 }
  0x1a   : > { %p853_p9 = por %p65_p8, %p64_p6  ;;  %s106_s7 = ssub.s32 %s756_s27, %s1061_s4 }
  0x1b   : > { %p107_p10 = scmp.eq.s32.totalorder %s106_s7, 0  ;;  %s109_s8 = sadd.s32 1, %s740_s24 }
  0x1c   : > { %s1044_s6 = scalar_select %p853_p9, 1, 0 }
  0x1d   : > { %s861_s9 = scalar_select %p107_p10, %s740_s24, %s109_s8  }
  0x1e   : > { %p119_p11 = scmp.ne.s32.totalorder %s740_s24, %s736_s23  ;;  %p120_p12 = scmp.eq.s32.totalorder %s454_s29, 1 }
  0x1f   : > { %p125_p13 = scmp.ne.s32.totalorder %s736_s23, %s732_s22  ;;  %p126_p0 = scmp.eq.s32.totalorder %s455_s30, 1 }
  0x20   : > { %p867_p1 = por %p120_p12, %p119_p11  ;;  %p493_p4 = scmp.lt.s32.totalorder %s760_s28, 2 }
  0x21   : > { %p872_p3 = por %p126_p0, %p125_p13  ;;  %s763_s12 = smov [#allocation4]  }
  0x22   : > { %s1045_s10 = scalar_select %p867_p1, 1, 0 }
  0x23   : > { %s1046_s11 = scalar_select %p872_p3, 1, 0 }
  0x24   : > { %s160_s13 = sshll.u32 %s763_s12, 4  ;;  %p879_p5 = pnand %p493_p4, %p849_p7  ;;  %s161_s13 = int_to_ptr.vmem [resolvable:$true] %s160_s13 }
  0x25   : > { %s591_s17 = scalar_lea.hbm %s1038_s1, 256 }
  0x26   : > { %p592_p6 = scmp.ne.s32.totalorder %s1038_s1, %s591_s17  ;;  %p593_p8 = pneg %p879_p5 }
  0x27   : > { %p598_p11 = scmp.lt.u32.totalorder %s591_s17, %s591_s17  ;;  %p600_p12 = scmp.lt.u32.totalorder %s591_s17, %s1038_s1 }
  0x28   : > { %p594_p10 = pnand %p593_p8, %p592_p6 }
  0x29   : > { %p601_p13 = por %p600_p12, %p598_p11 }
  0x2a   : > { %p595_p7 = pneg %p594_p10 }
  0x2c   : > { %p602_p0 = pnand %p601_p13, %p595_p7 }
  0x2e   : > { %605 = shalt.err (!%p602_p0)
}
  0x2f   : > { %s606_s25 = scalar_lea.vmem %s161_s13, 256  ;;  %s613_s29 = scalar_lea.vmem %s161_s13, 512 }
  0x30   : > { %p607_p4 = scmp.ne.s32.totalorder %s161_s13, %s606_s25  ;;  %p614_p1 = scmp.lt.s32.totalorder %s161_s13, %s161_s13 }
  0x31   : > { %p615_p9 = scmp.lt.s32.totalorder %s613_s29, %s606_s25 }
  0x32   : > { %p609_p2 = pnand %p607_p4, %p593_p8 }
  0x33   : > { %p616_p6 = por %p615_p9, %p614_p1 }
  0x34   : > { %p610_p3 = pneg %p609_p2 }
  0x36   : > { %p617_p10 = pnand %p616_p6, %p610_p3 }
  0x38   : > { %620 = shalt.err (!%p617_p10)
}
  0x39   : > { %s764_s30 = smov 128   ;;  %s765_s5 = smov 8  }
  0x3a   : > { %485 = dma.hbm_to_vmem [thread:$0]  (!%p879_p5), %s1038_s1, 256, %s161_s13, [#allocation5], %s764_s30, %s764_s30, %s765_s5  }
  0x3b   : > { %p464_p2 = scmp.ge.s32.totalorder %s760_s28, 1  ;;  %p192_p7 = scmp.lt.s32.totalorder %s760_s28, 3 }
  0x3c   : > { %s766_s15 = smov [#allocation7]   ;;  %s621_s19 = scalar_lea.hbm %s1039_s2, 256 }
  0x3d   : > { %p910_p11 = pnand %p464_p2, %p192_p7  ;;  %s184_s16 = sshll.u32 %s766_s15, 4  ;;  %s185_s16 = int_to_ptr.vmem [resolvable:$true] %s184_s16 }
  0x3e   : > { %p622_p9 = scmp.ne.s32.totalorder %s1039_s2, %s621_s19  ;;  %p628_p12 = scmp.lt.u32.totalorder %s621_s19, %s621_s19 }
  0x3f   : > { %s1048_s12 = scalar_select %p910_p11, 1, 0 }
  0x40   : > { %p624_p1 = pnand %p622_p9, %p593_p8  ;;  %p630_p13 = scmp.lt.u32.totalorder %s621_s19, %s1039_s2 }
  0x42   : > { %p625_p3 = pneg %p624_p1  ;;  %p631_p0 = por %p630_p13, %p628_p12 }
  0x44   : > { %p632_p4 = pnand %p631_p0, %p625_p3 }
  0x46   : > { %635 = shalt.err (!%p632_p4)
}
  0x47   : > { %s636_s29 = scalar_lea.vmem %s185_s16, 256  ;;  %s643_s7 = scalar_lea.vmem %s185_s16, 512 }
  0x48   : > { %p637_p6 = scmp.ne.s32.totalorder %s185_s16, %s636_s29  ;;  %p644_p7 = scmp.lt.s32.totalorder %s185_s16, %s185_s16 }
  0x49   : > { %p645_p11 = scmp.lt.s32.totalorder %s643_s7, %s636_s29 }
  0x4a   : > { %p639_p10 = pnand %p637_p6, %p593_p8 }
  0x4b   : > { %p646_p9 = por %p645_p11, %p644_p7 }
  0x4c   : > { %p640_p2 = pneg %p639_p10 }
  0x4e   : > { %p647_p1 = pnand %p646_p9, %p640_p2 }
  0x50   : > { %650 = shalt.err (!%p647_p1)
}
  0x51   : > { %488 = dma.hbm_to_vmem [thread:$0]  (!%p879_p5), %s1039_s2, 256, %s185_s16, [#allocation8], %s764_s30, %s764_s30, %s765_s5  }
  0x52   : > { %p1049_p3 = scmp.ne.s32.totalorder %s1048_s12, 0 }
  0x53   : > { %s198_s17 = sand.u32 (!%p1049_p3), 1, %s748_s26   ;;  %p1050_p8 = scmp.ne.s32.totalorder (!%p1049_p3), %s1044_s6, 0 }
  0x54   : > { %196 = sbr.rel (%p1049_p3) target bundleno = 182 (0xb6), region = 28  ;;  %s465_s18 = sshll.u32 (!%p1049_p3), %s198_s17, 4 }
  0x55   : > { %s199_s19 = scalar_lea.sflag (!%p1049_p3), [#allocation5], %s198_s17  ;;  %s202_s20 = scalar_lea.vmem (!%p1049_p3), [#allocation4], %s465_s18 }
  0x5b   : > { %718 = dma.done.wait (%p1050_p8), %s199_s19, 256  }
  0x5c   : > { %720 = vsyncadd (%p1050_p8), %s199_s19, 4294967040  ;;  %s208_s14 = scalar_lea.sflag [#allocation8], %s198_s17  ;;  %s211_s21 = scalar_lea.vmem [#allocation7], %s465_s18 }
  0x5d   : > { %722 = dma.done.wait (%p1050_p8), %s208_s14, 256  }
  0x5e   : > { %724 = vsyncadd (%p1050_p8), %s208_s14, 4294967040  ;;  %s234_s30 = sand.u32 1, %s736_s23   ;;  %s950_s5 = sld [smem:[#allocation3 + %s752_s0]]  ;;  %v767_v0 = vmov 0.0   ;;  %v252_v1 = vld [vmem:[%s202_s20] sm:$0xff]  ;;  %v253_v2 = vld [vmem:[%s202_s20 + $0x8] sm:$0xff] }
  0x5f   : > { %s474_s12 = smul.u32 24, %s234_s30  ;;  %v260_v3 = vand.u32 2147483647, %v252_v1  ;;  %v261_v4 = vand.u32 2147483647, %v253_v2  ;;  %v254_v13 = vld [vmem:[%s211_s21] sm:$0xff] }
  0x60   : > { %v255_v14 = vld [vmem:[%s211_s21 + $0x8] sm:$0xff]  ;;  %v256_v15 = vsub.f32 0.0, %v252_v1  ;;  %v257_v16 = vsub.f32 0.0, %v253_v2  ;;  %v276_v17 = vmul.f32 %v254_v13, %v252_v1 }
  0x61   : > { %s954_s16 = scalar_lea.vmem [#allocation9], %s474_s12  ;;  %v262_v5 = vsub.f32 0.0, %v260_v3  ;;  %v263_v6 = vsub.f32 0.0, %v261_v4  ;;  %v277_v18 = vmul.f32 %v255_v14, %v253_v2 }
  0x62   : > { %249 = vst [vmem:[%s954_s16] sm:$0xff] %v767_v0  ;;  %250 = vst [vmem:[%s954_s16 + $0x8] sm:$0xff] %v767_v0  ;;  %v258_v19 = vmax.f32 %v256_v15, 0.0  ;;  %v259_v21 = vmax.f32 %v257_v16, 0.0  ;;  %v278_v24 = vsub.f32 %v252_v1, %v276_v17 }
  0x63   : > { %251 = vst [vmem:[%s954_s16 + $0x10] sm:$0xff] %v767_v0  ;;  %v264_v7 = vmul.f32 1.442695, %v262_v5  ;;  %v266_v8 = vmul.f32 1.442695, %v263_v6  ;;  %v279_v26 = vsub.f32 %v253_v2, %v277_v18 }
  0x64   : > { %p467_p5 = scmp.ne.s32.totalorder %s950_s5, 2048 }
  0x65   : > { %573 = vpow2.f32 %v264_v7  ;;  %v291_v34 = vadd.f32 (!%p467_p5), %v255_v14, %v254_v13 }
  0x66   : > { %575 = vpow2.f32 %v266_v8 }
  0x69   : > { %v290_v33 = vld [vmem:[%s954_s16] sm:$0xff] (!%p467_p5)  ;;  %v294_v35 = vld [vmem:[%s954_s16 + $0x8] sm:$0xff] (!%p467_p5) }
  0x6a   : > { %v298_v37 = vld [vmem:[%s954_s16 + $0x10] sm:$0xff] (!%p467_p5)  ;;  %v292_v39 = vadd.f32 (!%p467_p5), %v291_v34, %v290_v33 }
  0x6c   : > { %293 = vst [vmem:[%s954_s16] sm:$0xff] (!%p467_p5), %v292_v39 }
  0x6f   : > { %v574_v9 = vpop.eup %573 }
  0x70   : > { %v576_v10 = vpop.eup %575  ;;  %v268_v11 = vadd.f32 1.0, %v574_v9 }
  0x71   : > { %v269_v12 = vadd.f32 1.0, %v576_v10 }
  0x72   : > { %577 = vlog2.f32 %v268_v11 }
  0x73   : > { %579 = vlog2.f32 %v269_v12 }
  0x7c   : > { %v578_v20 = vpop.eup %577  ;;  %289 = sbr.rel (%p467_p5) target bundleno = 137 (0x89), region = 44 }
  0x7d   : > { %v580_v22 = vpop.eup %579  ;;  %v271_v23 = vmul.f32 0.6931472, %v578_v20 }
  0x7e   : > { %v273_v25 = vmul.f32 0.6931472, %v580_v22 }
  0x7f   : > { %v274_v27 = vadd.f32 %v271_v23, %v258_v19 }
  0x80   : > { %v275_v28 = vadd.f32 %v273_v25, %v259_v21 }
  0x81   : > { %v280_v29 = vadd.f32 %v278_v24, %v274_v27  ;;  %v282_v30 = vmul.f32 %v274_v27, %v254_v13 }
  0x82   : > { %v281_v31 = vadd.f32 %v279_v26, %v275_v28  ;;  %v283_v32 = vmul.f32 %v275_v28, %v255_v14 }
  0x84   : > { %v295_v36 = vadd.f32 %v281_v31, %v280_v29  ;;  %v299_v38 = vadd.f32 %v283_v32, %v282_v30 }
  0x86   : > { %v296_v40 = vadd.f32 %v295_v36, %v294_v35  ;;  %v300_v41 = vadd.f32 %v299_v38, %v298_v37 }
  0x88   : > { %297 = vst [vmem:[%s954_s16 + $0x8] sm:$0xff] %v296_v40  ;;  %301 = vst [vmem:[%s954_s16 + $0x10] sm:$0xff] %v300_v41 }
  0x89 PF: > { %p468_p11 = scmp.eq.s32.totalorder %s950_s5, 2048 }
  0x8a   : > { %v306_v42 = vlaneseq (!%p468_p11)  ;;  %v315_v47 = vstv (!%p468_p11), %s950_s5  ;;  %v324_v55 = vld [vmem:[%s954_s16] sm:$0xff] (!%p468_p11) }
  0x8b   : > { %305 = sbr.rel (%p468_p11) target bundleno = 156 (0x9c), region = 48 }
  0x8c   : > { %v307_v43 = vshrl.u32 (!%p468_p11), %v306_v42, 7  ;;  %v310_v44 = vand.u32 (!%p468_p11), 127, %v306_v42 }
  0x8e   : > { %v308_v45 = vadd.s32 (!%p468_p11), 8, %v307_v43  ;;  %v311_v46 = vmul.u32 (!%p468_p11), 128, %v307_v43 }
  0x8f   : > { %v328_v57 = vld [vmem:[%s954_s16 + $0x8] sm:$0xff] (!%p468_p11)  ;;  %v332_v59 = vld [vmem:[%s954_s16 + $0x10] sm:$0xff] (!%p468_p11) }
  0x90   : > { %v312_v48 = vmul.u32 (!%p468_p11), 128, %v308_v45  ;;  %v313_v49 = vadd.s32 (!%p468_p11), %v311_v46, %v310_v44 }
  0x92   : > { %v314_v50 = vadd.s32 %v312_v48, %v310_v44  ;;  %vm316_vm0 = vcmp.lt.s32.totalorder %v313_v49, %v315_v47 }
  0x93   : > { %v318_v51 = vsel %vm316_vm0, %v254_v13, 0.0  ;;  %v320_v52 = vsel %vm316_vm0, %v280_v29, 0.0  ;;  %v322_v53 = vsel %vm316_vm0, %v282_v30, 0.0 }
  0x94   : > { %vm317_vm1 = vcmp.lt.s32.totalorder %v314_v50, %v315_v47 }
  0x95   : > { %v319_v54 = vsel %vm317_vm1, %v255_v14, 0.0  ;;  %v321_v56 = vsel %vm317_vm1, %v281_v31, 0.0  ;;  %v323_v58 = vsel %vm317_vm1, %v283_v32, 0.0 }
  0x96   : > { %v325_v60 = vadd.f32 %v319_v54, %v318_v51  ;;  %v329_v61 = vadd.f32 %v321_v56, %v320_v52  ;;  %v333_v62 = vadd.f32 %v323_v58, %v322_v53 }
  0x98   : > { %v326_v63 = vadd.f32 %v325_v60, %v324_v55  ;;  %v330_v0 = vadd.f32 %v329_v61, %v328_v57  ;;  %v334_v1 = vadd.f32 %v333_v62, %v332_v59 }
  0x9a   : > { %327 = vst [vmem:[%s954_s16] sm:$0xff] %v326_v63  ;;  %331 = vst [vmem:[%s954_s16 + $0x8] sm:$0xff] %v330_v0 }
  0x9b   : > { %335 = vst [vmem:[%s954_s16 + $0x10] sm:$0xff] %v334_v1 }
  0x9c PF: > { %s475_s6 = smul.u32 384, %s752_s0  ;;  %s350_s13 = sshll.u32 %s954_s16, 4  ;;  %s981_s13 = int_to_ptr.vmem [resolvable:$true] %s350_s13 }
  0x9d   : > { %s985_s8 = scalar_lea.sflag [#allocation6], %s234_s30  ;;  %s651_s15 = scalar_lea.vmem %s981_s13, 384 }
  0x9e   : > { %s979_s7 = scalar_lea.hbm %s1040_s3, %s475_s6  ;;  %p652_p12 = scmp.ne.s32.totalorder %s981_s13, %s651_s15 }
  0x9f   : > { %p1051_p13 = scmp.ne.s32.totalorder %s1045_s10, 0  ;;  %s768_s0 = smov [#allocation9]  }
  0xa0   : > { %s655_s17 = sshll.u32 %s768_s0, 4  ;;  %s656_s17 = int_to_ptr.vmem [resolvable:$false] %s655_s17 }
  0xa1   : > { %p653_p0 = pnand %p652_p12, %p1051_p13  ;;  %s657_s18 = scalar_lea.vmem %s656_s17, 768 }
  0xa2   : > { %p658_p6 = scmp.lt.s32.totalorder %s981_s13, %s656_s17  ;;  %p659_p10 = scmp.lt.s32.totalorder %s657_s18, %s651_s15 }
  0xa3   : > { %p654_p4 = pneg %p653_p0 }
  0xa4   : > { %p660_p2 = por %p659_p10, %p658_p6 }
  0xa6   : > { %p661_p7 = pnand %p660_p2, %p654_p4 }
  0xa8   : > { %664 = shalt.err (!%p661_p7)
}
  0xa9   : > { %s665_s19 = scalar_lea.hbm %s979_s7, 384  ;;  %s669_s21 = scalar_lea.hbm %s1040_s3, 768 }
  0xaa   : > { %p666_p9 = scmp.ne.s32.totalorder %s979_s7, %s665_s19  ;;  %p670_p8 = scmp.lt.u32.totalorder %s979_s7, %s1040_s3 }
  0xab   : > { %p671_p5 = scmp.lt.u32.totalorder %s669_s21, %s665_s19  ;;  %p673_p12 = scmp.lt.u32.totalorder %s665_s19, %s979_s7 }
  0xac   : > { %p667_p1 = pnand %p666_p9, %p1051_p13 }
  0xad   : > { %p672_p11 = por %p671_p5, %p670_p8 }
  0xae   : > { %p668_p3 = pneg %p667_p1 }
  0xaf   : > { %p674_p0 = por %p673_p12, %p672_p11 }
  0xb1   : > { %p675_p4 = pnand %p674_p0, %p668_p3 }
  0xb3   : > { %678 = shalt.err (!%p675_p4)
}
  0xb4   : > { %s769_s12 = smov 128   ;;  %s770_s16 = smov 8  }
  0xb5   : > { %480 = dma.vmem_to_hbm [thread:$0]  (%p1051_p13), %s981_s13, 384, %s979_s7, %s985_s8, %s769_s12, %s769_s12, %s770_s16  }
  0xb6 PF: > { %s365_s6 = sand.u32 1, %s732_s22   ;;  %p1052_p6 = scmp.ne.s32.totalorder %s1046_s11, 0 }
  0xb7   : > { %p1053_p10 = scmp.ge.s32.totalorder %s760_s28, 2  ;;  %s366_s25 = scalar_lea.sflag [#allocation6], %s365_s6 }
  0xb9   : > { %p490_p2 = pnand %p1053_p10, %p1052_p6 }
  0xbb   : > { %726 = dma.done.wait (!%p490_p2), %s366_s25, 384  }
  0xbc   : > { %728 = vsyncadd (!%p490_p2), %s366_s25, 4294966912  ;;  %s26_s28 = sadd.s32 1, %s760_s28   ;;  %s1054_s22 = smov %s736_s23 }
  0xbd   : > { %p23_p7 = scmp.ge.s32.totalorder %s26_s28, 4   ;;  %s1055_s23 = smov %s740_s24 }
  0xbe   : > { %s1056_s24 = smov %s861_s9  ;;  %s1057_s25 = smov %s748_s26 }
  0xbf   : > { %s1027_s26 = smov 0   ;;  %s1058_s0 = smov %s756_s27 }
  0xc0   : > { %s1059_s27 = smov %s1061_s4  ;;  %25 = sbr.rel (!%p23_p7) target bundleno = 21 (0x15), region = 98 }
  0xc7   :  { %371 = vsyncpa [#allocation5], 1 }
  0xc8   :  { %373 = vsyncpa [#allocation5 + $0x1], 1 }
  0xc9   :  { %374 = vsyncpa [#allocation8], 1 }
  0xca   :  { %376 = vsyncpa [#allocation8 + $0x1], 1 }
  0xcb   :  { %377 = vsyncpa [#allocation6], 1 }
  0xcc   :  { %379 = vsyncpa [#allocation6 + $0x1], 1 }

</bundles_post_ra>
